<compile_context>
chip_gen: v5e
topology: v5e:2x2
jax: 0.10.0
libtpu: 0.0.40
codegen_flags: <defaults>
</compile_context>

<pallas_src>
import functools

import jax
import jax.numpy as jnp
from jax.experimental import pallas as pl
from jax.experimental.pallas import tpu as pltpu


def _pixel_shuffle3d_kernel(x_ref, sw_ref, o_ref, *, r, td, h, w):
    # x_ref : (1, r^2, TD*H, W)        sub-channels (rh, rw) for this (b, c, d-block, rd)
    # sw_ref: (r, W, W*r)              one-hot lane spread: SW[rw][w, q] = [q == w*r + rw]
    # o_ref : (1, 1, TD, 1, H, r*W*r)  block of the free output view (B, C, D, r, H, r*W*r)
    wr = w * r
    for rh in range(r):
        acc = None
        for rw in range(r):
            xk = x_ref[0, rh * r + rw]                       # (TD*H, W)
            # One-hot f32 spread on the MXU: each output element is 1*x + 0*... so it is
            # exact for finite inputs; M = TD*H is sized up by the tile picker.
            t = jnp.dot(xk, sw_ref[rw], preferred_element_type=jnp.float32)
            acc = t if acc is None else acc + t              # (TD*H, W*r), disjoint lanes
        chunk = acc.reshape(td, h, wr).astype(o_ref.dtype)
        # Static, contiguous lane slice per rh — no ED matmul, no full-width accumulator,
        # no strided/masked full-row stores.
        o_ref[0, 0, :, 0, :, pl.ds(rh * wr, wr)] = chunk


def _round_up(n, m):
    return ((n + m - 1) // m) * m


def _vmem_limit_bytes():
    # 128 MiB-VMEM parts (v5e/v6e): allow big blocks; 64 MiB (v7x) or unknown: stay <=48 MiB.
    try:
        cap = int(pltpu.get_tpu_info().vmem_capacity_bytes)
    except Exception:
        cap = 0
    return (96 << 20) if cap >= (100 << 20) else (48 << 20)


def _pick_depth_tile(D, H, W, r, itemsize, vmem_limit):
    """Largest TD (divisor of D; (TD*H)%8==0 or TD==D) whose true per-step residency —
    2x double-buffered input + output blocks (with lane/sublane padding), the SW
    constants and the f32 accumulator temporaries — fits in ~80% of the VMEM limit."""
    wr = W * r
    lane_in = _round_up(W, 128)
    lane_out = _round_up(r * wr, 128)
    lane_acc = _round_up(wr, 128)
    sw_bytes = 2 * r * _round_up(W, 8) * lane_acc * itemsize      # double-buffered constants

    def resident(td):
        sub = _round_up(td * H, 8)
        in_blk = r * r * sub * lane_in * itemsize
        out_blk = td * _round_up(H, 8) * lane_out * itemsize
        acc = 2 * sub * lane_acc * 4                              # f32 temporaries
        return 2 * in_blk + 2 * out_blk + acc

    budget = int(vmem_limit * 0.8) - sw_bytes - (2 << 20)
    cands = [td for td in range(D, 0, -1)
             if D % td == 0 and (td == D or (td * H) % 8 == 0)]
    for td in cands:                                              # cands is never empty (td==D)
        if resident(td) <= budget:
            return td
    return cands[-1]


def pixel_shuffle_3d(x, upscale_factor):
    r = int(upscale_factor)
    B, Cin, D, H, W = x.shape
    assert Cin % (r ** 3) == 0, "channels must be divisible by upscale_factor**3"
    if r == 1:
        return x
    assert jnp.issubdtype(x.dtype, jnp.floating), "MXU one-hot spread needs a float dtype"
    C = Cin // (r ** 3)
    dt = x.dtype
    itemsize = jnp.dtype(dt).itemsize
    wr = W * r

    vmem_limit = _vmem_limit_bytes()
    TD = _pick_depth_tile(D, H, W, r, itemsize, vmem_limit)

    # SW[rw][w, q] = 1 iff q == w*r + rw — the only spread matrix left (KB-scale).
    q_idx = jnp.arange(wr)[None, None, :]
    w_idx = jnp.arange(W)[None, :, None]
    rw_idx = jnp.arange(r)[:, None, None]
    SW = (q_idx == w_idx * r + rw_idx).astype(dt)                 # (r, W, W*r)

    # Free contiguous views: input merges (D, H) so the kernel needs no in-kernel relayout;
    # output splits (D*r -> D, r) and (H*r, W*r -> H, r*W*r) so the rd / rh interleaves are
    # pure addressing.  (Input lane width is W; for shallow stages with W < 128 loads are
    # partially masked — low cost, noted from the review.)
    x_view = x.reshape(B, Cin, D * H, W)

    kernel = functools.partial(_pixel_shuffle3d_kernel, r=r, td=TD, h=H, w=W)

    out_view = pl.pallas_call(
        kernel,
        out_shape=jax.ShapeDtypeStruct((B, C, D, r, H, r * wr), dt),
        grid_spec=pltpu.PrefetchScalarGridSpec(
            num_scalar_prefetch=0,
            # total steps = B*C*(D/TD)*r — even and >=2, so both v7x TCs get work.
            grid=(B, C, D // TD, r),
            in_specs=[
                pl.BlockSpec((1, r * r, TD * H, W),
                             lambda b, c, d, rd: (b, c * r + rd, d, 0)),
                # TODO(synk): could single-buffer this constant with pipeline_mode=
                # pl.Buffered(1); it is KB-scale now that ES/ED are gone, so left default.
                pl.BlockSpec((r, W, wr), lambda b, c, d, rd: (0, 0, 0)),
            ],
            out_specs=pl.BlockSpec((1, 1, TD, 1, H, r * wr),
                                   lambda b, c, d, rd: (b, c, d, rd, 0, 0)),
        ),
        compiler_params=pltpu.CompilerParams(
            dimension_semantics=("parallel", "parallel", "parallel", "parallel"),
            vmem_limit_bytes=vmem_limit,
        ),
    )(x_view, SW)

    # Free contiguous view back to NCDHW: (B, C, D, r, H, r*W*r) -> (B, C, D*r, H*r, W*r).
    return out_view.reshape(B, C, D * r, H * r, W * r)


if __name__ == "__main__":
    r = 2
    B, C, D, H, W = 2, 2, 4, 8, 8
    Cin = C * r ** 3  # 16

    key = jax.random.PRNGKey(0)
    x = jax.random.normal(key, (B, Cin, D, H, W), dtype=jnp.float32)

    out = jax.block_until_ready(pixel_shuffle_3d(x, r))

    # Pure-JAX reference replicating torch PixelShuffle3D.forward exactly.
    ref = x.reshape(B, C, r, r, r, D, H, W)
    ref = jnp.transpose(ref, (0, 1, 5, 2, 6, 3, 7, 4))
    ref = ref.reshape(B, C, D * r, H * r, W * r)

    assert out.shape == ref.shape and out.dtype == ref.dtype
    # Tight check (vs the old atol=1e-5): the one-hot spread is 1*x + 0*... under the
    # MXU's f32 path, so only sub-ULP slack is tolerated here.
    assert jnp.allclose(out, ref, atol=0.0, rtol=1e-6), "mismatch vs reference"
    print("KERNEL_OK")
</pallas_src>

<mosaic_0001>
module attributes {stable_mosaic.version = 11 : i64} {
  func.func @_pixel_shuffle3d_kernel(%arg0: i32, %arg1: i32, %arg2: i32, %arg3: i32, %arg4: memref<1x4x32x8xf32, #tpu.memory_space<vmem>>, %arg5: memref<2x8x16xf32, #tpu.memory_space<vmem>>, %arg6: memref<1x1x4x1x8x32xf32, #tpu.memory_space<vmem>>) attributes {dimension_semantics = [#tpu.dimension_semantics<parallel>, #tpu.dimension_semantics<parallel>, #tpu.dimension_semantics<parallel>, #tpu.dimension_semantics<parallel>], iteration_bounds = array<i64: 2, 2, 1, 2>, scalar_prefetch = 0 : i64, scratch_operands = 0 : i64, tpu.core_type = #tpu.core_type<tc>, window_params = [{transform_indices = @transform_0, window_bounds = array<i64: 1, 4, 32, 8>}, {pipeline_mode = #tpu.pipeline_mode<synchronous>, transform_indices = @transform_1, window_bounds = array<i64: 2, 8, 16>}, {transform_indices = @transform_2, window_bounds = array<i64: 1, 1, 4, 1, 8, 32>}]} {
    %c0 = arith.constant 0 : index
    %c0_0 = arith.constant 0 : index
    %c0_1 = arith.constant 0 : index
    %c0_2 = arith.constant 0 : index
    %0 = vector.load %arg4[%c0, %c0_0, %c0_1, %c0_2] : memref<1x4x32x8xf32, #tpu.memory_space<vmem>>, vector<1x1x32x8xf32>
    %1 = vector.shape_cast %0 : vector<1x1x32x8xf32> to vector<32x8xf32>
    %c0_3 = arith.constant 0 : index
    %c0_4 = arith.constant 0 : index
    %c0_5 = arith.constant 0 : index
    %2 = vector.load %arg5[%c0_3, %c0_4, %c0_5] : memref<2x8x16xf32, #tpu.memory_space<vmem>>, vector<1x8x16xf32>
    %3 = vector.shape_cast %2 : vector<1x8x16xf32> to vector<8x16xf32>
    %cst = arith.constant dense<0.000000e+00> : vector<32x16xf32>
    %4 = tpu.matmul %1, %3, %cst {dimension_numbers = #tpu.dot_dimension_numbers<[1], [0], [0], [1], [0, 0, 1, 1], [], []>} : vector<32x8xf32>, vector<8x16xf32>, vector<32x16xf32> -> vector<32x16xf32>
    %c0_6 = arith.constant 0 : index
    %c1 = arith.constant 1 : index
    %c0_7 = arith.constant 0 : index
    %c0_8 = arith.constant 0 : index
    %5 = vector.load %arg4[%c0_6, %c1, %c0_7, %c0_8] : memref<1x4x32x8xf32, #tpu.memory_space<vmem>>, vector<1x1x32x8xf32>
    %6 = vector.shape_cast %5 : vector<1x1x32x8xf32> to vector<32x8xf32>
    %c1_9 = arith.constant 1 : index
    %c0_10 = arith.constant 0 : index
    %c0_11 = arith.constant 0 : index
    %7 = vector.load %arg5[%c1_9, %c0_10, %c0_11] : memref<2x8x16xf32, #tpu.memory_space<vmem>>, vector<1x8x16xf32>
    %8 = vector.shape_cast %7 : vector<1x8x16xf32> to vector<8x16xf32>
    %cst_12 = arith.constant dense<0.000000e+00> : vector<32x16xf32>
    %9 = tpu.matmul %6, %8, %cst_12 {dimension_numbers = #tpu.dot_dimension_numbers<[1], [0], [0], [1], [0, 0, 1, 1], [], []>} : vector<32x8xf32>, vector<8x16xf32>, vector<32x16xf32> -> vector<32x16xf32>
    %10 = arith.addf %4, %9 : vector<32x16xf32>
    %11 = vector.shape_cast %10 : vector<32x16xf32> to vector<4x8x16xf32>
    %c0_13 = arith.constant 0 : index
    %c0_14 = arith.constant 0 : index
    %c0_15 = arith.constant 0 : index
    %c0_16 = arith.constant 0 : index
    %c0_17 = arith.constant 0 : index
    %c0_18 = arith.constant 0 : index
    %12 = vector.load %arg6[%c0_13, %c0_14, %c0_15, %c0_16, %c0_17, %c0_18] : memref<1x1x4x1x8x32xf32, #tpu.memory_space<vmem>>, vector<1x1x4x1x8x16xf32>
    %13 = vector.shape_cast %12 : vector<1x1x4x1x8x16xf32> to vector<4x8x16xf32>
    %14 = vector.shape_cast %11 : vector<4x8x16xf32> to vector<1x1x4x1x8x16xf32>
    tpu.vector_store %arg6[%c0_13, %c0_14, %c0_15, %c0_16, %c0_17, %c0_18], %14 {strides = array<i32>} : memref<1x1x4x1x8x32xf32, #tpu.memory_space<vmem>>, vector<1x1x4x1x8x16xf32>,
    %c0_19 = arith.constant 0 : index
    %c2 = arith.constant 2 : index
    %c0_20 = arith.constant 0 : index
    %c0_21 = arith.constant 0 : index
    %15 = vector.load %arg4[%c0_19, %c2, %c0_20, %c0_21] : memref<1x4x32x8xf32, #tpu.memory_space<vmem>>, vector<1x1x32x8xf32>
    %16 = vector.shape_cast %15 : vector<1x1x32x8xf32> to vector<32x8xf32>
    %c0_22 = arith.constant 0 : index
    %c0_23 = arith.constant 0 : index
    %c0_24 = arith.constant 0 : index
    %17 = vector.load %arg5[%c0_22, %c0_23, %c0_24] : memref<2x8x16xf32, #tpu.memory_space<vmem>>, vector<1x8x16xf32>
    %18 = vector.shape_cast %17 : vector<1x8x16xf32> to vector<8x16xf32>
    %cst_25 = arith.constant dense<0.000000e+00> : vector<32x16xf32>
    %19 = tpu.matmul %16, %18, %cst_25 {dimension_numbers = #tpu.dot_dimension_numbers<[1], [0], [0], [1], [0, 0, 1, 1], [], []>} : vector<32x8xf32>, vector<8x16xf32>, vector<32x16xf32> -> vector<32x16xf32>
    %c0_26 = arith.constant 0 : index
    %c3 = arith.constant 3 : index
    %c0_27 = arith.constant 0 : index
    %c0_28 = arith.constant 0 : index
    %20 = vector.load %arg4[%c0_26, %c3, %c0_27, %c0_28] : memref<1x4x32x8xf32, #tpu.memory_space<vmem>>, vector<1x1x32x8xf32>
    %21 = vector.shape_cast %20 : vector<1x1x32x8xf32> to vector<32x8xf32>
    %c1_29 = arith.constant 1 : index
    %c0_30 = arith.constant 0 : index
    %c0_31 = arith.constant 0 : index
    %22 = vector.load %arg5[%c1_29, %c0_30, %c0_31] : memref<2x8x16xf32, #tpu.memory_space<vmem>>, vector<1x8x16xf32>
    %23 = vector.shape_cast %22 : vector<1x8x16xf32> to vector<8x16xf32>
    %cst_32 = arith.constant dense<0.000000e+00> : vector<32x16xf32>
    %24 = tpu.matmul %21, %23, %cst_32 {dimension_numbers = #tpu.dot_dimension_numbers<[1], [0], [0], [1], [0, 0, 1, 1], [], []>} : vector<32x8xf32>, vector<8x16xf32>, vector<32x16xf32> -> vector<32x16xf32>
    %25 = arith.addf %19, %24 : vector<32x16xf32>
    %26 = vector.shape_cast %25 : vector<32x16xf32> to vector<4x8x16xf32>
    %c0_33 = arith.constant 0 : index
    %c0_34 = arith.constant 0 : index
    %c0_35 = arith.constant 0 : index
    %c0_36 = arith.constant 0 : index
    %c0_37 = arith.constant 0 : index
    %c16 = arith.constant 16 : index
    %27 = vector.load %arg6[%c0_33, %c0_34, %c0_35, %c0_36, %c0_37, %c16] : memref<1x1x4x1x8x32xf32, #tpu.memory_space<vmem>>, vector<1x1x4x1x8x16xf32>
    %28 = vector.shape_cast %27 : vector<1x1x4x1x8x16xf32> to vector<4x8x16xf32>
    %29 = vector.shape_cast %26 : vector<4x8x16xf32> to vector<1x1x4x1x8x16xf32>
    tpu.vector_store %arg6[%c0_33, %c0_34, %c0_35, %c0_36, %c0_37, %c16], %29 {strides = array<i32>} : memref<1x1x4x1x8x32xf32, #tpu.memory_space<vmem>>, vector<1x1x4x1x8x16xf32>,
    return
  }
  func.func @transform_0(%arg0: i32, %arg1: i32, %arg2: i32, %arg3: i32) -> (i32, i32, i32, i32) {
    %c2_i32 = arith.constant 2 : i32
    %0 = arith.muli %arg1, %c2_i32 : i32
    %1 = arith.addi %0, %arg3 : i32
    %c0_i32 = arith.constant 0 : i32
    %c0_i32_0 = arith.constant 0 : i32
    return %arg0, %1, %arg2, %c0_i32 : i32, i32, i32, i32
  }
  func.func @transform_1(%arg0: i32, %arg1: i32, %arg2: i32, %arg3: i32) -> (i32, i32, i32) {
    %c0_i32 = arith.constant 0 : i32
    %c0_i32_0 = arith.constant 0 : i32
    %c0_i32_1 = arith.constant 0 : i32
    %c0_i32_2 = arith.constant 0 : i32
    return %c0_i32, %c0_i32_0, %c0_i32_1 : i32, i32, i32
  }
  func.func @transform_2(%arg0: i32, %arg1: i32, %arg2: i32, %arg3: i32) -> (i32, i32, i32, i32, i32, i32) {
    %c0_i32 = arith.constant 0 : i32
    %c0_i32_0 = arith.constant 0 : i32
    %c0_i32_1 = arith.constant 0 : i32
    return %arg0, %arg1, %arg2, %arg3, %c0_i32, %c0_i32_0 : i32, i32, i32, i32, i32, i32
  }
}

</mosaic_0001>

<bundles_post_ra>
// kernel: tpu_custom_call.1
= control target key start
LH: loop header
LB: loop body
LE: loop exit
PB: predicated region body
PF: predicated region fallthrough
CT: control target
= control target key end

     0   :  { %7 = vsyncpa [#allocation3], 0  ;;  %s1022_s0 = inlined_call_operand.vmem [shape: f32[2,16,32,8], index: 0, kind: input, shape index: {}]   ;;  %s1023_s1 = inlined_call_operand.vmem [shape: f32[2,8,16], index: 1, kind: input, shape index: {}]   ;;  %s1024_s2 = inlined_call_operand.hbm [shape: f32[2,2,4,2,8,32], index: 2, kind: output, shape index: {}]  }
   0x1   :  { %9 = vsyncpa [#allocation3 + $0x1], 0  ;;  %s832_s9 = smov 0   ;;  %s834_s10 = smov 0  }
   0x2   :  { %s836_s11 = smov 0   ;;  %s838_s12 = smov 0  }
   0x3   :  { %s840_s13 = smov 0   ;;  %s842_s14 = smov 0  }
   0x4   :  { %s844_s15 = smov 0   ;;  %s846_s16 = smov 0  }
   0x5   :  { %s848_s17 = smov 0   ;;  %s850_s18 = smov 0  }
   0x6 LB: > { %s561_s19 = sadd.s32 4294967295, %s811_s18   ;;  %s30_s20 = sadd.s32 1, %s799_s15  ;;  %s811_s18 = sphi %s850_s18, %s15_s18   ;;  %s807_s17 = sphi %s848_s17, %s1035_s17   ;;  %s803_s16 = sphi %s846_s16, %s1034_s16   ;;  %s799_s15 = sphi %s844_s15, %s1033_s15   ;;  %s795_s14 = sphi %s842_s14, %s1032_s14   ;;  %s791_s13 = sphi %s840_s13, %s1031_s13   ;;  %s787_s12 = sphi %s838_s12, %s1030_s12   ;;  %s783_s11 = sphi %s836_s11, %s1029_s11   ;;  %s779_s10 = sphi %s834_s10, %s1028_s10   ;;  %s775_s9 = sphi %s832_s9, %s1027_s9  }
   0x7   : > { %p31_p0 = scmp.ge.s32.totalorder %s30_s20, 2  ;;  %s37_s21 = sadd.s32 1, %s803_s16 }
   0x8   : > { %s562_s22 = sadd.s32 4294967294, %s811_s18   ;;  %p119_p1 = scmp.ne.s32.totalorder %s783_s11, %s779_s10 }
   0x9   : > { %s1037_s20 = smov (%p31_p0, %s30_s20), 0  ;;  %s1039_s21 = smov (!%p31_p0, %s37_s21), %s803_s16 }
   0xa   : > { %s41_s23 = sadd.s32 1, %s807_s17  ;;  %p120_p2 = scmp.eq.s32.totalorder %s561_s19, 7 }
   0xb   : > { %p39_p3 = scmp.ge.s32.totalorder %s1039_s21, 2  ;;  %p125_p4 = scmp.ne.s32.totalorder %s779_s10, %s775_s9 }
   0xc   : > { %p894_p5 = por %p120_p2, %p119_p1  ;;  %p126_p6 = scmp.eq.s32.totalorder %s562_s22, 7 }
   0xd   : > { %s1041_s21 = smov (%p39_p3, %s1039_s21), 0  ;;  %s1043_s23 = smov (!%p39_p3, %s41_s23), %s807_s17 }
   0xe   : > { %p901_p7 = por %p126_p6, %p125_p4  ;;  %p43_p8 = scmp.ge.s32.totalorder %s1043_s23, 2 }
   0xf   : > { %p567_p9 = scmp.ge.s32.totalorder %s811_s18, 1  ;;  %s101_s26 = ssub.s32 %s803_s16, %s1041_s21 }
  0x10   : > { %p170_p10 = scmp.lt.s32.totalorder %s811_s18, 9  ;;  %s1045_s23 = smov (%p43_p8, %s1043_s23), 0 }
  0x11   : > { %s105_s27 = ssub.s32 %s799_s15, %s1037_s20  ;;  %s100_s28 = ssub.s32 %s807_s17, %s1045_s23 }
  0x12   : > { %p171_p11 = pnand %p567_p9, %p170_p10  ;;  %s102_s29 = sor.u32 %s101_s26, %s100_s28 }
  0x13   : > { %s106_s30 = sor.u32 %s105_s27, %s102_s29  ;;  %s109_s3 = sadd.s32 1, %s783_s11 }
  0x14   : > { %p107_p12 = scmp.eq.s32.totalorder %s106_s30, 0  ;;  %174 = sbr.rel (%p171_p11) target bundleno = 313 (0x139), region = 28 }
  0x15   : > { %s569_s19 = sshll.u32 (!%p171_p11), %s791_s13, 1  ;;  %p207_p13 = scmp.lt.s32.totalorder (!%p171_p11), %s795_s14, 1 }
  0x16   : > { %s917_s4 = scalar_select %p107_p12, %s783_s11, %s109_s3  }
  0x17   : > { %s204_s22 = sadd.s32 (!%p171_p11), %s787_s12, %s569_s19  ;;  %s200_s8 = sand.u32 (!%p171_p11), 1, %s779_s10  }
  0x18   : > { %s570_s26 = sshll.u32 (!%p171_p11), %s204_s22, 2  ;;  %s568_s19 = sshll.u32 (!%p171_p11), %s200_s8, 5 }
  0x19   : > { %v595_v0 = vld [vmem:[%s1023_s1 + $0x8] sm:$0xff]  ;;  %v329_v1 = vld [vmem:[%s1023_s1] sm:$0xff]  ;;  %s208_s27 = scalar_select %p207_p13, %s795_s14, 1  ;;  %vm236_vm0 = vcmask 64512   ;;  %vm319_vm1 = vcmask 130048   ;;  %vm434_vm2 = vcmask 261248  }
  0x1a   : > { %363 = vmatpush.msra.mxu2 %v595_v0  ;;  %404 = vmatpush.msra.mxu3 %v329_v1  ;;  %p209_p0 = scmp.lt.s32.totalorder %s570_s26, 15  ;;  %s951_s22 = scalar_lea.vmem [#allocation2], %s568_s19 }
  0x1b   : > { %264 = vmatpush.msra.mxu0 %v595_v0  ;;  %305 = vmatpush.msra.mxu1 %v329_v1  ;;  %s572_s28 = sshll.u32 %s208_s27, 6  ;;  %s605_s27 = sshll.u32 %s791_s13, 3 }
  0x1c   : > { %s1047_s26 = smov (!%p209_p0, %s570_s26), 15  ;;  %s458_s19 = sshll.u32 %s951_s22, 4  ;;  %s459_s19 = int_to_ptr.vmem [resolvable:$true] %s458_s19 }
  0x1d   : > { %s571_s29 = sshll.u32 %s1047_s26, 2  ;;  %s813_s26 = smov 16  }
  0x1e   : > { %s216_s30 = sadd.s32 %s572_s28, %s571_s29  ;;  %s453_s28 = sadd.s32 %s787_s12, %s605_s27 }
  0x1f   : > { %s573_s3 = sshll.u32 %s216_s30, 3  ;;  %s606_s29 = sshll.u32 %s795_s14, 4 }
  0x20   : > { %s218_s7 = scalar_lea.vmem %s1022_s0, %s573_s3  ;;  %s455_s30 = sadd.s32 %s606_s29, %s453_s28 }
  0x21   : > { %v591_v2 = vld [vmem:[%s218_s7 + $0x60] sm:$0xff]  ;;  %v592_v6 = vld [vmem:[%s218_s7 + $0x68] sm:$0xff]  ;;  %v593_v10 = vld [vmem:[%s218_s7 + $0x70] sm:$0xff]  ;;  %s607_s3 = sshll.u32 %s455_s30, 3  ;;  %s440_s12 = scalar_lea.sflag [#allocation3], %s200_s8 }
  0x22   : > { %v587_v3 = vld [vmem:[%s218_s7 + $0x40] sm:$0xff]  ;;  %596 = vmatmul.msk.f32.vlgmr.msra.gmra.mxu2 %vm236_vm0, %v591_v2  ;;  %v588_v7 = vld [vmem:[%s218_s7 + $0x48] sm:$0xff]  ;;  %v589_v11 = vld [vmem:[%s218_s7 + $0x50] sm:$0xff]  ;;  %s721_s29 = scalar_lea.hbm %s1024_s2, 256 }
  0x23   : > { %600 = vmatmul.msk.f32.vlgmr.msra.gmra.mxu3 %vm236_vm0, %v587_v3  ;;  %v574_v4 = vld [vmem:[%s218_s7 + $0x20] sm:$0xff]  ;;  %v575_v8 = vld [vmem:[%s218_s7 + $0x28] sm:$0xff]  ;;  %v594_v12 = vld [vmem:[%s218_s7 + $0x78] sm:$0xff] }
  0x24   : > { %579 = vmatmul.msk.f32.vlgmr.msra.gmra.mxu0 %vm236_vm0, %v574_v4  ;;  %v224_v5 = vld [vmem:[%s218_s7] sm:$0xff]  ;;  %v225_v9 = vld [vmem:[%s218_s7 + $0x8] sm:$0xff]  ;;  %v590_v13 = vld [vmem:[%s218_s7 + $0x58] sm:$0xff] }
  0x25   : > { %583 = vmatmul.msk.f32.vlgmr.msra.gmra.mxu1 %vm236_vm0, %v224_v5  ;;  %v576_v14 = vld [vmem:[%s218_s7 + $0x30] sm:$0xff]  ;;  %v577_v16 = vld [vmem:[%s218_s7 + $0x38] sm:$0xff] }
  0x26   : > { %v226_v15 = vld [vmem:[%s218_s7 + $0x10] sm:$0xff]  ;;  %v227_v17 = vld [vmem:[%s218_s7 + $0x18] sm:$0xff]  ;;  %s457_s7 = scalar_lea.hbm %s1024_s2, %s607_s3 }
  0x2a   : > { %597 = vmatmul.msk.f32.gmra.mxu2 %vm236_vm0, %v592_v6 }
  0x2b   : > { %601 = vmatmul.msk.f32.gmra.mxu3 %vm236_vm0, %v588_v7 }
  0x2c   : > { %580 = vmatmul.msk.f32.gmra.mxu0 %vm236_vm0, %v575_v8 }
  0x2d   : > { %584 = vmatmul.msk.f32.gmra.mxu1 %vm236_vm0, %v225_v9 }
  0x32   : > { %598 = vmatmul.msk.f32.gmra.mxu2 %vm236_vm0, %v593_v10 }
  0x33   : > { %602 = vmatmul.msk.f32.gmra.mxu3 %vm236_vm0, %v589_v11 }
  0x34   : > { %581 = vmatmul.msk.f32.gmra.mxu0 %vm236_vm0, %v576_v14 }
  0x35   : > { %585 = vmatmul.msk.f32.gmra.mxu1 %vm236_vm0, %v226_v15 }
  0x3a   : > { %599 = vmatmul.msk.f32.gmra.mxu2 %vm236_vm0, %v594_v12 }
  0x3b   : > { %603 = vmatmul.msk.f32.gmra.mxu3 %vm236_vm0, %v590_v13 }
  0x3c   : > { %582 = vmatmul.msk.f32.gmra.mxu0 %vm236_vm0, %v577_v16 }
  0x3d   : > { %586 = vmatmul.msk.f32.gmra.mxu1 %vm236_vm0, %v227_v17 }
  0xa1   : > { %v266_v18 = vpop.f32.mrf.mxu0 }
  0xa2   : > { %v307_v19 = vpop.f32.mrf.mxu1 }
  0xa3   : > { %v308_v20 = vadd.f32 %v307_v19, %v266_v18 }
  0xa5   : > { %v365_v21 = vpop.f32.mrf.mxu2  ;;  %320 = vst.msk [vmem:[%s951_s22] sm:$0xff] %vm319_vm1, %v308_v20 }
  0xa6   : > { %v406_v22 = vpop.f32.mrf.mxu3 }
  0xa7   : > { %v407_v23 = vadd.f32 %v406_v22, %v365_v21 }
  0xa9   : > { %422 = vrot.lane.b32.xlu0 %v407_v23, %s813_s26  ;;  %v269_v33 = vpop.f32.mrf.mxu0 }
  0xaa   : > { %v310_v34 = vpop.f32.mrf.mxu1 }
  0xab   : > { %v311_v35 = vadd.f32 %v310_v34, %v269_v33 }
  0xad   : > { %v368_v24 = vpop.f32.mrf.mxu2  ;;  %321 = vst.msk [vmem:[%s951_s22 + $0x8] sm:$0xff] %vm319_vm1, %v311_v35 }
  0xae   : > { %v409_v25 = vpop.f32.mrf.mxu3 }
  0xaf   : > { %v410_v26 = vadd.f32 %v409_v25, %v368_v24 }
  0xb1   : > { %424 = vrot.lane.b32.xlu0 %v410_v26, %s813_s26  ;;  %v272_v36 = vpop.f32.mrf.mxu0 }
  0xb2   : > { %v313_v37 = vpop.f32.mrf.mxu1 }
  0xb3   : > { %v314_v38 = vadd.f32 %v313_v37, %v272_v36 }
  0xb5   : > { %v371_v27 = vpop.f32.mrf.mxu2  ;;  %322 = vst.msk [vmem:[%s951_s22 + $0x10] sm:$0xff] %vm319_vm1, %v314_v38 }
  0xb6   : > { %v412_v28 = vpop.f32.mrf.mxu3 }
  0xb7   : > { %v413_v29 = vadd.f32 %v412_v28, %v371_v27 }
  0xb9   : > { %426 = vrot.lane.b32.xlu1 %v413_v29, %s813_s26  ;;  %v275_v39 = vpop.f32.mrf.mxu0 }
  0xba   : > { %v316_v40 = vpop.f32.mrf.mxu1 }
  0xbb   : > { %v317_v41 = vadd.f32 %v316_v40, %v275_v39 }
  0xbd   : > { %v374_v30 = vpop.f32.mrf.mxu2  ;;  %323 = vst.msk [vmem:[%s951_s22 + $0x18] sm:$0xff] %vm319_vm1, %v317_v41 }
  0xbe   : > { %v415_v31 = vpop.f32.mrf.mxu3 }
  0xbf   : > { %v416_v32 = vadd.f32 %v415_v31, %v374_v30 }
  0xc1   : > { %428 = vrot.lane.b32.xlu1 %v416_v32, %s813_s26  ;;  %s460_s26 = sshll.u32 %s457_s7, 4  ;;  %s461_s26 = int_to_ptr.hbm [resolvable:$true] %s460_s26 }
  0xc2   : > { %s715_s13 = sshra.s32 %s461_s26, 4  ;;  %s716_s13 = int_to_ptr.hbm [resolvable:$true] %s715_s13 }
  0xc3   : > { %s717_s14 = scalar_lea.hbm %s716_s13, 32  ;;  %p722_p4 = scmp.lt.s32.totalorder %s716_s13, %s1024_s2 }
  0xc4   : > { %p718_p1 = scmp.ne.s32.totalorder %s716_s13, %s717_s14  ;;  %p723_p6 = scmp.lt.s32.totalorder %s721_s29, %s717_s14 }
  0xc6   : > { %p719_p2 = pnand %p718_p1, %p894_p5  ;;  %p724_p8 = por %p723_p6, %p722_p4 }
  0xc8   : > { %p720_p3 = pneg %p719_p2 }
  0xca   : > { %p725_p9 = pnand %p724_p8, %p720_p3 }
 0x11b   : > { %v423_v42 = vpop.permute.xlu0 %422 }
 0x11c   : > { %435 = vst.msk [vmem:[%s951_s22] sm:$0xff] %vm434_vm2, %v423_v42 }
 0x123   : > { %v425_v43 = vpop.permute.xlu0 %424 }
 0x124   : > { %436 = vst.msk [vmem:[%s951_s22 + $0x8] sm:$0xff] %vm434_vm2, %v425_v43 }
 0x12b   : > { %v427_v44 = vpop.permute.xlu1 %426 }
 0x12c   : > { %437 = vst.msk [vmem:[%s951_s22 + $0x10] sm:$0xff] %vm434_vm2, %v427_v44 }
 0x133   : > { %v429_v45 = vpop.permute.xlu1 %428 }
 0x134   : > { %438 = vst.msk [vmem:[%s951_s22 + $0x18] sm:$0xff] %vm434_vm2, %v429_v45 }
 0x135   : > { %728 = shalt.err (!%p725_p9)
}
 0x136   : > { %s814_s8 = smov 128   ;;  %s815_s22 = smov 256  }
 0x137   : > { %s816_s5 = smov 8  }
 0x138   : > { %610 = dma.vmem_to_hbm [thread:$0]  (%p894_p5), %s459_s19, 512, %s461_s26, %s440_s12, %s814_s8, %s815_s22, %s816_s5  }
 0x139 PF: > { %p616_p10 = scmp.ge.s32.totalorder %s811_s18, 2  ;;  %s475_s6 = sand.u32 1, %s775_s9  }
 0x13a   : > { %s476_s7 = scalar_lea.sflag [#allocation3], %s475_s6 }
 0x13b   : > { %p613_p11 = pnand %p616_p10, %p901_p7 }
 0x13d   : > { %p614_p12 = pneg %p613_p11 }
 0x13f   : > { %770 = dma.done.wait (%p614_p12), %s476_s7, 512  }
 0x140   : > { %772 = vsyncadd (%p614_p12), %s476_s7, 4294966784  ;;  %s15_s18 = sadd.s32 1, %s811_s18   ;;  %s1027_s9 = smov %s779_s10 }
 0x141   : > { %p12_p13 = scmp.ge.s32.totalorder %s15_s18, 10   ;;  %s1028_s10 = smov %s783_s11 }
 0x142   : > { %s1029_s11 = smov %s917_s4  ;;  %s1030_s12 = smov %s799_s15 }
 0x143   : > { %s1031_s13 = smov %s803_s16  ;;  %s1032_s14 = smov %s807_s17 }
 0x144   : > { %s1033_s15 = smov %s1037_s20  ;;  %s1034_s16 = smov %s1041_s21 }
 0x145   : > { %s1035_s17 = smov %s1045_s23  ;;  %14 = sbr.rel (!%p12_p13) target bundleno = 6 (0x6), region = 67 }
 0x14a   :  { %482 = vsyncpa [#allocation3], 1 }
 0x14b   :  { %484 = vsyncpa [#allocation3 + $0x1], 1 }

</bundles_post_ra>
